<compile_context>
chip_gen: v7x
topology: tpu7x:2x2x1
jax: 0.10.0
libtpu: 0.0.40
codegen_flags: <defaults>
</compile_context>

<pallas_src>
import jax
import jax.numpy as jnp
from jax.experimental import pallas as pl
from jax.experimental.pallas import tpu as pltpu

_MiB = 1024 * 1024


def _affine_kernel(gamma_ref, beta_ref, x_ref, o_ref):
    # gamma_ref/beta_ref: (t_r, 1) f32 per-row affine params (broadcast over lanes)
    # x_ref/o_ref       : (t_r, t_hw) lane-dense tile of the (Rf, HWf) view
    x = x_ref[...].astype(jnp.float32)
    o_ref[...] = (x * gamma_ref[...] + beta_ref[...]).astype(o_ref.dtype)


def _choose_tiles(n_rows, n_lanes, itemsize, sub_mult):
    """Pick a (t_r, t_hw) block for the (n_rows, n_lanes) elementwise view.

    Blocks are sized purely by bytes (~1-6 MiB of x per block; >=8 grid steps
    once the tensor is large). cdiv grids handle ragged remainders, so nothing
    has to divide evenly and the array itself is never padded.
    """
    total_bytes = n_rows * n_lanes * itemsize
    target = max(1 * _MiB, min(6 * _MiB, total_bytes // 8))
    if n_rows * 128 * itemsize > target:
        # Huge row count: tile rows as well, one 128-lane column per block.
        t_r = (target // (128 * itemsize)) // sub_mult * sub_mult
        t_r = min(max(sub_mult, t_r), n_rows)
        t_hw = 128 if n_lanes >= 128 else n_lanes
    else:
        # All rows resident; size the lane tile by the remaining budget.
        t_r = n_rows
        max_lanes = target // (n_rows * itemsize)
        if max_lanes >= n_lanes:
            t_hw = n_lanes                       # full extent (may be ragged vs 128)
        else:
            t_hw = max(128, (max_lanes // 128) * 128)
    return t_r, t_hw


def per_channel_affine(x, gamma, beta):
    """y[b,c,h,w] = x[b,c,h,w] * gamma[c] + beta[c] via a Pallas TPU kernel."""
    B, C, H, W = x.shape
    itemsize = jnp.dtype(x.dtype).itemsize
    sub_mult = max(8, 32 // itemsize)            # native sublane multiple for dtype

    R, HW = B * C, H * W
    # If B*C underfills the sublanes, fold part of HW into the row axis so
    # loads/stores stay sublane-dense (but keep >=128 lanes for dense vst).
    fold = 1
    while R * fold < sub_mult and HW % (fold * 2) == 0 and HW // (fold * 2) >= 128:
        fold *= 2
    Rf, HWf = R * fold, HW // fold

    x2d = x.reshape(Rf, HWf)                     # pure view; no pad, no copy

    # Per-row f32 params: row r -> channel (r // fold) % C.
    gamma_rows = jnp.broadcast_to(
        gamma.astype(jnp.float32).reshape(1, C, 1, 1), (B, C, fold, 1)
    ).reshape(Rf, 1)
    beta_rows = jnp.broadcast_to(
        beta.astype(jnp.float32).reshape(1, C, 1, 1), (B, C, fold, 1)
    ).reshape(Rf, 1)

    t_r, t_hw = _choose_tiles(Rf, HWf, itemsize, sub_mult)
    grid = (pl.cdiv(Rf, t_r), pl.cdiv(HWf, t_hw))

    out2d = pl.pallas_call(
        _affine_kernel,
        out_shape=jax.ShapeDtypeStruct((Rf, HWf), x.dtype),
        grid=grid,
        in_specs=[
            pl.BlockSpec((t_r, 1), lambda i, j: (i, 0)),     # gamma (per row block)
            pl.BlockSpec((t_r, 1), lambda i, j: (i, 0)),     # beta
            pl.BlockSpec((t_r, t_hw), lambda i, j: (i, j)),  # x tile
        ],
        out_specs=pl.BlockSpec((t_r, t_hw), lambda i, j: (i, j)),
        input_output_aliases={2: 0},             # donate x's HBM buffer to the output
        cost_estimate=pl.CostEstimate(
            flops=2 * Rf * HWf,
            transcendentals=0,
            bytes_accessed=2 * Rf * HWf * itemsize,
        ),
        compiler_params=pltpu.CompilerParams(
            dimension_semantics=("parallel", "parallel"),
            vmem_limit_bytes=48 * _MiB,          # safe on v5e/v6e/v7x; blocks <= ~6 MiB
        ),
    )(gamma_rows, beta_rows, x2d)

    return out2d.reshape(B, C, H, W)


class RandomApplyWrapperPallas:
    """JAX/Pallas equivalent of RandomApplyWrapper(transform, p) where the
    wrapped transform is a deterministic per-channel affine."""

    # TODO(synk): the original module wraps an arbitrary nn.Module transform;
    # only the per-channel-affine instantiation is implemented as a kernel.

    def __init__(self, gamma, beta, p: float = 0.5):
        self.gamma = gamma
        self.beta = beta
        self.p = p

    def __call__(self, x, key):
        if x.ndim != 4:
            raise ValueError(
                f"Expected input of shape [B, C, H, W], but got {x.shape}")
        # Mirrors `torch.rand(1).item() < self.p`. The identity branch skips
        # the kernel entirely (no HBM traffic) and passes x through bit-exact.
        u = jax.random.uniform(key, ())
        return jax.lax.cond(
            u < self.p,
            lambda xx: per_channel_affine(xx, self.gamma, self.beta),
            lambda xx: xx,
            x,
        )


if __name__ == "__main__":
    key = jax.random.PRNGKey(0)
    kx, kflag, kx2 = jax.random.split(key, 3)

    B, C, H, W = 2, 4, 16, 16
    x = jax.random.normal(kx, (B, C, H, W), dtype=jnp.float32)

    # Deterministic "transform" parameters (per-channel affine).
    gamma = jnp.linspace(0.5, 1.5, C, dtype=jnp.float32)
    beta = jnp.linspace(-0.25, 0.25, C, dtype=jnp.float32)

    # Pure-JAX reference.
    y_ref = x * gamma[None, :, None, None] + beta[None, :, None, None]

    # 1) Transform (kernel) path, f32.
    y = jax.block_until_ready(per_channel_affine(x, gamma, beta))
    assert y.shape == (B, C, H, W)
    assert jnp.allclose(y, y_ref, atol=1e-6)

    # 1b) Non-multiple-of-128 spatial size exercises the ragged-block path
    #     (no host-side pad/slice anymore).
    x_odd = jax.random.normal(kx2, (B, C, 10, 10), dtype=jnp.float32)
    y_odd_ref = x_odd * gamma[None, :, None, None] + beta[None, :, None, None]
    y_odd = jax.block_until_ready(per_channel_affine(x_odd, gamma, beta))
    assert jnp.allclose(y_odd, y_odd_ref, atol=1e-6)

    # 1c) bf16 input exercises the sublane-fold path and the f32-compute/cast path.
    x_bf16 = x.astype(jnp.bfloat16)
    y_bf16 = jax.block_until_ready(per_channel_affine(x_bf16, gamma, beta))
    y_bf16_ref = (x_bf16.astype(jnp.float32) * gamma[None, :, None, None]
                  + beta[None, :, None, None])
    assert jnp.allclose(y_bf16.astype(jnp.float32), y_bf16_ref, atol=5e-2)

    # 2) Full RandomApplyWrapper semantics (random apply-or-identity branch).
    wrapper = RandomApplyWrapperPallas(gamma, beta, p=0.5)
    out = jax.block_until_ready(wrapper(x, kflag))
    u = jax.random.uniform(kflag, ())
    ref = y_ref if bool(u < 0.5) else x
    assert out.shape == (B, C, H, W)
    assert jnp.allclose(out, ref, atol=1e-6)

    print("KERNEL_OK")
</pallas_src>

<mosaic_0001>
module attributes {stable_mosaic.version = 11 : i64} {
  func.func @_affine_kernel(%arg0: i32, %arg1: i32, %arg2: memref<8x1xf32, #tpu.memory_space<vmem>>, %arg3: memref<8x1xf32, #tpu.memory_space<vmem>>, %arg4: memref<8x256xf32, #tpu.memory_space<vmem>>, %arg5: memref<8x256xf32, #tpu.memory_space<vmem>>) attributes {dimension_semantics = [#tpu.dimension_semantics<parallel>, #tpu.dimension_semantics<parallel>], iteration_bounds = array<i64: 1, 1>, scalar_prefetch = 0 : i64, scratch_operands = 0 : i64, tpu.core_type = #tpu.core_type<tc>, window_params = [{transform_indices = @transform_0, window_bounds = array<i64: 8, 1>}, {transform_indices = @transform_1, window_bounds = array<i64: 8, 1>}, {transform_indices = @transform_2, window_bounds = array<i64: 8, 256>}, {transform_indices = @transform_3, window_bounds = array<i64: 8, 256>}]} {
    %c0 = arith.constant 0 : index
    %c0_0 = arith.constant 0 : index
    %0 = vector.load %arg4[%c0, %c0_0] : memref<8x256xf32, #tpu.memory_space<vmem>>, vector<8x256xf32>
    %c0_1 = arith.constant 0 : index
    %c0_2 = arith.constant 0 : index
    %1 = vector.load %arg2[%c0_1, %c0_2] : memref<8x1xf32, #tpu.memory_space<vmem>>, vector<8x1xf32>
    %2 = vector.broadcast %1 : vector<8x1xf32> to vector<8x256xf32>
    %3 = arith.mulf %0, %2 : vector<8x256xf32>
    %c0_3 = arith.constant 0 : index
    %c0_4 = arith.constant 0 : index
    %4 = vector.load %arg3[%c0_3, %c0_4] : memref<8x1xf32, #tpu.memory_space<vmem>>, vector<8x1xf32>
    %5 = vector.broadcast %4 : vector<8x1xf32> to vector<8x256xf32>
    %6 = arith.addf %3, %5 : vector<8x256xf32>
    %c0_5 = arith.constant 0 : index
    %c0_6 = arith.constant 0 : index
    %7 = vector.load %arg5[%c0_5, %c0_6] : memref<8x256xf32, #tpu.memory_space<vmem>>, vector<8x256xf32>
    tpu.vector_store %arg5[%c0_5, %c0_6], %6 {strides = array<i32>} : memref<8x256xf32, #tpu.memory_space<vmem>>, vector<8x256xf32>,
    return
  }
  func.func @transform_0(%arg0: i32, %arg1: i32) -> (i32, i32) {
    %c0_i32 = arith.constant 0 : i32
    %c0_i32_0 = arith.constant 0 : i32
    return %arg0, %c0_i32 : i32, i32
  }
  func.func @transform_1(%arg0: i32, %arg1: i32) -> (i32, i32) {
    %c0_i32 = arith.constant 0 : i32
    %c0_i32_0 = arith.constant 0 : i32
    return %arg0, %c0_i32 : i32, i32
  }
  func.func @transform_2(%arg0: i32, %arg1: i32) -> (i32, i32) {
    %c0_i32 = arith.constant 0 : i32
    return %arg0, %arg1 : i32, i32
  }
  func.func @transform_3(%arg0: i32, %arg1: i32) -> (i32, i32) {
    %c0_i32 = arith.constant 0 : i32
    return %arg0, %arg1 : i32, i32
  }
}

</mosaic_0001>

<bundles_post_ra>
// kernel: tpu_custom_call.1
= control target key start
LH: loop header
LB: loop body
LE: loop exit
PB: predicated region body
PF: predicated region fallthrough
CT: control target
= control target key end

     0   :  { %8 = vsyncpa [#allocation3], 0  ;;  %s167_s0 = inlined_call_operand.vmem [shape: f32[8,1], index: 0, kind: input, shape index: {}]   ;;  %s168_s1 = inlined_call_operand.vmem [shape: f32[8,1], index: 1, kind: input, shape index: {}]   ;;  %s169_s2 = inlined_call_operand.hbm [shape: f32[8,256], index: 2, kind: input, shape index: {}, may-alias: {2,3}]   ;;  %s170_s3 = inlined_call_operand.hbm [shape: f32[8,256], index: 3, kind: output, shape index: {}, may-alias: {2,3}]  }
   0x1   :  { %9 = vsyncpa [#allocation4], 0  ;;  %s114_s12 = smov [#allocation2]   ;;  %s66_s16 = scalar_lea.hbm %s169_s2, 256 }
   0x2   :  { %s20_s13 = sshll.u32 %s114_s12, 4  ;;  %p67_p0 = scmp.ne.s32.totalorder %s169_s2, %s66_s16  ;;  %s21_s13 = int_to_ptr.vmem [resolvable:$true] %s20_s13 }
   0x3   :  { %p70_p1 = scmp.lt.u32.totalorder %s66_s16, %s169_s2 }
   0x5   :  { %p72_p2 = pnand %p70_p1, %p67_p0 }
   0x7   :  { %75 = shalt.err (!%p72_p2)
}
   0x8   :  { %s76_s21 = scalar_lea.vmem %s21_s13, 256  ;;  %p81_p4 = scmp.lt.s32.totalorder %s21_s13, %s21_s13 }
   0x9   :  { %p77_p3 = scmp.ne.s32.totalorder %s21_s13, %s76_s21  ;;  %p82_p5 = scmp.lt.s32.totalorder %s76_s21, %s76_s21 }
   0xb   :  { %p83_p6 = por %p82_p5, %p81_p4 }
   0xd   :  { %p84_p7 = pnand %p83_p6, %p77_p3 }
   0xf   :  { %87 = shalt.err (!%p84_p7)
}
  0x10   :  { %23 = dma.hbm_to_vmem [thread:$0]  %s169_s2, 256, %s21_s13, [#allocation3]  }
  0x11   :  { %110 = dma.done.wait [#allocation3], 256  }
  0x12   :  { %111 = vsyncadd [#allocation3], 4294967040  ;;  %v115_v0 = vmov 0   ;;  %v29_v1 = vld [vmem:[%s167_s0] sm:$0xff]  ;;  %v28_v5 = vld [vmem:[#allocation2 + $0x8] sm:$0xff]  ;;  %s116_s28 = smov [#allocation5]  }
  0x13   :  { %65 = vset.pattern.permute.xlu0 %v115_v0  ;;  %v37_v2 = vld [vmem:[%s168_s1] sm:$0xff]  ;;  %s53_s29 = sshll.u32 %s116_s28, 4  ;;  %s54_s29 = int_to_ptr.vmem [resolvable:$true] %s53_s29 }
  0x14   :  { %32 = vperm.xlu0 %65, %v29_v1   ;;  %v27_v4 = vld [vmem:[#allocation2] sm:$0xff]  ;;  %s88_s0 = scalar_lea.vmem %s54_s29, 256  ;;  %p93_p9 = scmp.lt.s32.totalorder %s54_s29, %s54_s29 }
  0x15   :  { %p89_p8 = scmp.ne.s32.totalorder %s54_s29, %s88_s0  ;;  %p94_p10 = scmp.lt.s32.totalorder %s88_s0, %s88_s0 }
  0x17   :  { %p95_p11 = por %p94_p10, %p93_p9 }
  0x18   :  { %40 = vperm.xlu0 %65, %v37_v2  }
  0x19   :  { %p96_p12 = pnand %p95_p11, %p89_p8 }
  0x93   :  { %v33_v3 = vpop.permute.xlu0 %32 }
  0x94   :  { %v35_v6 = vmul.f32 %v33_v3, %v27_v4  ;;  %v36_v7 = vmul.f32 %v33_v3, %v28_v5 }
  0x97   :  { %v41_v8 = vpop.permute.xlu0 %40 }
  0x98   :  { %v43_v9 = vadd.f32 %v41_v8, %v35_v6  ;;  %v44_v10 = vadd.f32 %v41_v8, %v36_v7 }
  0x9a   :  { %45 = vst [vmem:[#allocation5] sm:$0xff] %v43_v9  ;;  %46 = vst [vmem:[#allocation5 + $0x8] sm:$0xff] %v44_v10 }
  0x9b   :  { %99 = shalt.err (!%p96_p12)
}
  0x9c   :  { %s100_s30 = scalar_lea.hbm %s170_s3, 256 }
  0x9d   :  { %p101_p13 = scmp.ne.s32.totalorder %s170_s3, %s100_s30  ;;  %p104_p0 = scmp.lt.u32.totalorder %s100_s30, %s170_s3 }
  0x9f   :  { %p106_p1 = pnand %p104_p0, %p101_p13 }
  0xa1   :  { %109 = shalt.err (!%p106_p1)
}
  0xa2   :  { %56 = dma.vmem_to_hbm [thread:$0]  %s54_s29, 256, %s170_s3, [#allocation4]  }
  0xa3   :  { %112 = dma.done.wait [#allocation4], 256  }
  0xa4   :  { %113 = vsyncadd [#allocation4], 4294967040 }
  0xa5   :  { %60 = vsyncpa [#allocation3], 1 }
  0xa6   :  { %61 = vsyncpa [#allocation4], 1 }

</bundles_post_ra>
